<compile_context>
chip_gen: v6e
topology: v6e:2x2x1
jax: 0.10.0
libtpu: 0.0.40
codegen_flags: <defaults>
</compile_context>

<pallas_src>
import functools

import jax
import jax.numpy as jnp
from jax import lax
from jax.experimental import pallas as pl
from jax.experimental.pallas import tpu as pltpu

FEATURE_DIM = 256        # fixed by the PyTorch module
LANE = 128
TILE_B_MAX = 2048        # double-buffered x/out tiles stay far under VMEM limits


def _round_up(n, m):
    return (n + m - 1) // m * m


def _pick_tile_b(batch):
    """Batch tile: large enough to amortize per-step overhead; for non-tiny
    batches force >= 2 grid programs so both v7x TensorCores get work."""
    if batch <= 16:
        return batch                         # single exact block (== full dim)
    half = _round_up(pl.cdiv(batch, 2), 8)   # keep sublane-aligned tiles
    return min(TILE_B_MAX, half)


def net_kernel(x_ref, w1_ref, b1_ref, wh_ref, bh_ref, probs_ref, v_ref, *,
               action_dim):
    # feature_block: Linear(state_dim, 256) + ReLU (bf16 operands, f32 acc).
    xb = x_ref[...].astype(jnp.bfloat16)
    f = jnp.dot(xb, w1_ref[...], preferred_element_type=jnp.float32)
    f = jnp.maximum(f + b1_ref[...], 0.0)

    # Fused heads: one MXU pass -> [action logits | V | zero padding].
    head = jnp.dot(f.astype(jnp.bfloat16), wh_ref[...],
                   preferred_element_type=jnp.float32) + bh_ref[...]

    # (1, head_pad) lane index, broadcast over batch rows (no per-row iota).
    lane = lax.broadcasted_iota(jnp.int32, (1, head.shape[-1]), 1)

    # Value head: f32 column at lane `action_dim` via a masked cross-lane sum.
    v_ref[...] = jnp.sum(jnp.where(lane == action_dim, head, 0.0),
                         axis=-1, keepdims=True)

    # Masked, max-stabilized, EXACT softmax over the real action lanes only.
    logits = head + jnp.where(lane < action_dim, 0.0, -jnp.inf)
    m = jnp.max(logits, axis=-1, keepdims=True)
    e = jnp.exp(logits - m)                        # padded lanes -> exp(-inf)=0
    denom = jnp.sum(e, axis=-1, keepdims=True)
    probs_ref[...] = (e / denom).astype(probs_ref.dtype)


def net_forward(x, w1, b1, w2, b2, w3, b3):
    """x:(B, state_dim) f32; weights stored as (in, out) == torch weight.T.

    Returns (probs, V): probs bf16 (B, action_dim), V f32 (B, 1)."""
    B, state_dim = x.shape
    action_dim = w2.shape[1]
    head_pad = _round_up(action_dim + 1, LANE)

    tile_b = _pick_tile_b(B)
    grid = (pl.cdiv(B, tile_b),)   # partial last block: OOB stores are masked

    # Fused head weight/bias slab: cols [0:A) = A_block, col A = V_block,
    # remaining lanes zero.  One-time, tiny.
    w_head = jnp.zeros((FEATURE_DIM, head_pad), jnp.float32)
    w_head = w_head.at[:, :action_dim].set(w2).at[:, action_dim].set(w3[:, 0])
    w_head = w_head.astype(jnp.bfloat16)
    b_head = jnp.zeros((1, head_pad), jnp.float32)
    b_head = b_head.at[:, :action_dim].set(b2).at[:, action_dim].set(b3[:, 0])

    out_probs, out_v = pl.pallas_call(
        functools.partial(net_kernel, action_dim=action_dim),
        out_shape=(jax.ShapeDtypeStruct((B, head_pad), jnp.bfloat16),
                   jax.ShapeDtypeStruct((B, 1), jnp.float32)),
        grid=grid,
        in_specs=[
            pl.BlockSpec((tile_b, state_dim), lambda i: (i, 0)),       # x
            pl.BlockSpec((state_dim, FEATURE_DIM), lambda i: (0, 0)),  # w1
            pl.BlockSpec((1, FEATURE_DIM), lambda i: (0, 0)),          # b1
            pl.BlockSpec((FEATURE_DIM, head_pad), lambda i: (0, 0)),   # w_head
            pl.BlockSpec((1, head_pad), lambda i: (0, 0)),             # b_head
        ],
        out_specs=(
            pl.BlockSpec((tile_b, head_pad), lambda i: (i, 0)),        # probs
            pl.BlockSpec((tile_b, 1), lambda i: (i, 0)),               # V
        ),
        compiler_params=pltpu.CompilerParams(
            dimension_semantics=("parallel",)),
    )(x, w1.astype(jnp.bfloat16), b1, w_head, b_head)

    # Single wrapper-side slice of the probs slab; V needs no slicing.
    probs = out_probs[:, :action_dim]
    return probs, out_v


def init_params(key, state_dim, action_dim):
    """Deterministic (Kaiming-uniform-ish) init mirroring nn.Linear shapes."""
    ks = jax.random.split(key, 6)

    def lin(kw, kb, fan_in, fan_out):
        bound = 1.0 / jnp.sqrt(fan_in)
        w = jax.random.uniform(kw, (fan_in, fan_out), jnp.float32, -bound, bound)
        b = jax.random.uniform(kb, (1, fan_out), jnp.float32, -bound, bound)
        return w, b

    w1, b1 = lin(ks[0], ks[1], state_dim, FEATURE_DIM)
    w2, b2 = lin(ks[2], ks[3], FEATURE_DIM, action_dim)
    w3, b3 = lin(ks[4], ks[5], FEATURE_DIM, 1)
    return w1, b1, w2, b2, w3, b3


def reference_forward(x, w1, b1, w2, b2, w3, b3):
    # Same bf16-operand / f32-accumulate policy as the kernel.
    xb = x.astype(jnp.bfloat16)
    f = jnp.maximum(
        jnp.dot(xb, w1.astype(jnp.bfloat16),
                preferred_element_type=jnp.float32) + b1, 0.0)
    fb = f.astype(jnp.bfloat16)
    logits = jnp.dot(fb, w2.astype(jnp.bfloat16),
                     preferred_element_type=jnp.float32) + b2
    probs = jax.nn.softmax(logits, axis=-1)
    v = jnp.dot(fb, w3.astype(jnp.bfloat16),
                preferred_element_type=jnp.float32) + b3
    return probs, v


# TODO(synk): select_action (Categorical sampling) and loss_func are host-side
# training utilities, not part of the forward pass; not implemented as kernels.

if __name__ == "__main__":
    batch, state_dim, action_dim = 4, 32, 8
    key = jax.random.PRNGKey(0)
    kx, kp = jax.random.split(key)
    x = jax.random.normal(kx, (batch, state_dim), jnp.float32)
    params = init_params(kp, state_dim, action_dim)

    probs, v = net_forward(x, *params)
    jax.block_until_ready((probs, v))

    probs_ref, v_ref = reference_forward(x, *params)
    probs_f32 = probs.astype(jnp.float32)
    assert probs.shape == (batch, action_dim)
    assert v.shape == (batch, 1)
    # bf16 probs output adds <= ~2^-9 relative quantization on top of the
    # exact f32 softmax computed in-kernel.
    assert jnp.allclose(probs_f32, probs_ref, atol=2e-3, rtol=5e-3)
    assert jnp.allclose(v, v_ref, atol=2e-4, rtol=2e-4)
    # Exact normalization in-kernel; residual |sum - 1| is bounded by the
    # bf16 output quantization (~action_dim * 2^-9).
    assert jnp.allclose(jnp.sum(probs_f32, axis=-1), 1.0, atol=4e-3)

    print("KERNEL_OK")
</pallas_src>

<mosaic_0001>
module attributes {stable_mosaic.version = 11 : i64} {
  func.func @net_kernel(%arg0: i32, %arg1: memref<4x32xf32, #tpu.memory_space<vmem>>, %arg2: memref<32x256xbf16, #tpu.memory_space<vmem>>, %arg3: memref<1x256xf32, #tpu.memory_space<vmem>>, %arg4: memref<256x128xbf16, #tpu.memory_space<vmem>>, %arg5: memref<1x128xf32, #tpu.memory_space<vmem>>, %arg6: memref<4x128xbf16, #tpu.memory_space<vmem>>, %arg7: memref<4x1xf32, #tpu.memory_space<vmem>>) attributes {dimension_semantics = [#tpu.dimension_semantics<parallel>], iteration_bounds = array<i64: 1>, scalar_prefetch = 0 : i64, scratch_operands = 0 : i64, tpu.core_type = #tpu.core_type<tc>, window_params = [{transform_indices = @transform_0, window_bounds = array<i64: 4, 32>}, {pipeline_mode = #tpu.pipeline_mode<synchronous>, transform_indices = @transform_1, window_bounds = array<i64: 32, 256>}, {pipeline_mode = #tpu.pipeline_mode<synchronous>, transform_indices = @transform_2, window_bounds = array<i64: 1, 256>}, {pipeline_mode = #tpu.pipeline_mode<synchronous>, transform_indices = @transform_3, window_bounds = array<i64: 256, 128>}, {pipeline_mode = #tpu.pipeline_mode<synchronous>, transform_indices = @transform_4, window_bounds = array<i64: 1, 128>}, {transform_indices = @transform_5, window_bounds = array<i64: 4, 128>}, {transform_indices = @transform_6, window_bounds = array<i64: 4, 1>}]} {
    %c0 = arith.constant 0 : index
    %c0_0 = arith.constant 0 : index
    %0 = vector.load %arg1[%c0, %c0_0] : memref<4x32xf32, #tpu.memory_space<vmem>>, vector<4x32xf32>
    %1 = arith.truncf %0 : vector<4x32xf32> to vector<4x32xbf16>
    %c0_1 = arith.constant 0 : index
    %c0_2 = arith.constant 0 : index
    %2 = vector.load %arg2[%c0_1, %c0_2] : memref<32x256xbf16, #tpu.memory_space<vmem>>, vector<32x256xbf16>
    %cst = arith.constant dense<0.000000e+00> : vector<4x256xf32>
    %3 = tpu.matmul %1, %2, %cst {dimension_numbers = #tpu.dot_dimension_numbers<[1], [0], [0], [1], [0, 0, 1, 1], [], []>} : vector<4x32xbf16>, vector<32x256xbf16>, vector<4x256xf32> -> vector<4x256xf32>
    %c0_3 = arith.constant 0 : index
    %c0_4 = arith.constant 0 : index
    %4 = vector.load %arg3[%c0_3, %c0_4] : memref<1x256xf32, #tpu.memory_space<vmem>>, vector<1x256xf32>
    %5 = vector.broadcast %4 : vector<1x256xf32> to vector<4x256xf32>
    %6 = arith.addf %3, %5 : vector<4x256xf32>
    %cst_5 = arith.constant 0.000000e+00 : f32
    %7 = vector.broadcast %cst_5 : f32 to vector<4x256xf32>
    %8 = arith.maximumf %6, %7 : vector<4x256xf32>
    %9 = arith.truncf %8 : vector<4x256xf32> to vector<4x256xbf16>
    %c0_6 = arith.constant 0 : index
    %c0_7 = arith.constant 0 : index
    %10 = vector.load %arg4[%c0_6, %c0_7] : memref<256x128xbf16, #tpu.memory_space<vmem>>, vector<256x128xbf16>
    %cst_8 = arith.constant dense<0.000000e+00> : vector<4x128xf32>
    %11 = tpu.matmul %9, %10, %cst_8 {dimension_numbers = #tpu.dot_dimension_numbers<[1], [0], [0], [1], [0, 0, 1, 1], [], []>} : vector<4x256xbf16>, vector<256x128xbf16>, vector<4x128xf32> -> vector<4x128xf32>
    %c0_9 = arith.constant 0 : index
    %c0_10 = arith.constant 0 : index
    %12 = vector.load %arg5[%c0_9, %c0_10] : memref<1x128xf32, #tpu.memory_space<vmem>>, vector<1x128xf32>
    %13 = vector.broadcast %12 : vector<1x128xf32> to vector<4x128xf32>
    %14 = arith.addf %11, %13 : vector<4x128xf32>
    %15 = tpu.iota {dimensions = array<i32: 1>} : vector<1x128xi32>
    %c8_i32 = arith.constant 8 : i32
    %16 = vector.broadcast %c8_i32 : i32 to vector<1x128xi32>
    %17 = arith.cmpi eq, %15, %16 : vector<1x128xi32>
    %cst_11 = arith.constant 0.000000e+00 : f32
    %18 = vector.shape_cast %17 : vector<1x128xi1> to vector<1x128xi1>
    %19 = vector.broadcast %18 : vector<1x128xi1> to vector<4x128xi1>
    %20 = vector.broadcast %cst_11 : f32 to vector<4x128xf32>
    %21 = arith.select %19, %14, %20 : vector<4x128xi1>, vector<4x128xf32>
    %cst_12 = arith.constant dense<0.000000e+00> : vector<4xf32>
    %22 = vector.multi_reduction <add>, %21, %cst_12 [1] : vector<4x128xf32> to vector<4xf32>
    %23 = vector.shape_cast %22 : vector<4xf32> to vector<4x1xf32>
    %c0_13 = arith.constant 0 : index
    %c0_14 = arith.constant 0 : index
    %24 = vector.load %arg7[%c0_13, %c0_14] : memref<4x1xf32, #tpu.memory_space<vmem>>, vector<4x1xf32>
    tpu.vector_store %arg7[%c0_13, %c0_14], %23 {strides = array<i32>} : memref<4x1xf32, #tpu.memory_space<vmem>>, vector<4x1xf32>,
    %c8_i32_15 = arith.constant 8 : i32
    %25 = vector.broadcast %c8_i32_15 : i32 to vector<1x128xi32>
    %26 = arith.cmpi slt, %15, %25 : vector<1x128xi32>
    %cst_16 = arith.constant 0.000000e+00 : f32
    %cst_17 = arith.constant 0xFF800000 : f32
    %27 = vector.broadcast %cst_16 : f32 to vector<1x128xf32>
    %28 = vector.broadcast %cst_17 : f32 to vector<1x128xf32>
    %29 = arith.select %26, %27, %28 : vector<1x128xi1>, vector<1x128xf32>
    %30 = vector.broadcast %29 : vector<1x128xf32> to vector<4x128xf32>
    %31 = arith.addf %14, %30 : vector<4x128xf32>
    %cst_18 = arith.constant dense<0xFF800000> : vector<4xf32>
    %32 = vector.multi_reduction <maximumf>, %31, %cst_18 [1] : vector<4x128xf32> to vector<4xf32>
    %33 = vector.shape_cast %32 : vector<4xf32> to vector<4x1xf32>
    %34 = vector.broadcast %33 : vector<4x1xf32> to vector<4x128xf32>
    %35 = arith.subf %31, %34 : vector<4x128xf32>
    %36 = math.exp %35 : vector<4x128xf32>
    %cst_19 = arith.constant dense<0.000000e+00> : vector<4xf32>
    %37 = vector.multi_reduction <add>, %36, %cst_19 [1] : vector<4x128xf32> to vector<4xf32>
    %38 = vector.shape_cast %37 : vector<4xf32> to vector<4x1xf32>
    %39 = vector.broadcast %38 : vector<4x1xf32> to vector<4x128xf32>
    %40 = arith.divf %36, %39 : vector<4x128xf32>
    %41 = arith.truncf %40 : vector<4x128xf32> to vector<4x128xbf16>
    %c0_20 = arith.constant 0 : index
    %c0_21 = arith.constant 0 : index
    %42 = vector.load %arg6[%c0_20, %c0_21] : memref<4x128xbf16, #tpu.memory_space<vmem>>, vector<4x128xbf16>
    tpu.vector_store %arg6[%c0_20, %c0_21], %41 {strides = array<i32>} : memref<4x128xbf16, #tpu.memory_space<vmem>>, vector<4x128xbf16>,
    return
  }
  func.func @transform_0(%arg0: i32) -> (i32, i32) {
    %c0_i32 = arith.constant 0 : i32
    %c0_i32_0 = arith.constant 0 : i32
    return %arg0, %c0_i32 : i32, i32
  }
  func.func @transform_1(%arg0: i32) -> (i32, i32) {
    %c0_i32 = arith.constant 0 : i32
    %c0_i32_0 = arith.constant 0 : i32
    %c0_i32_1 = arith.constant 0 : i32
    return %c0_i32, %c0_i32_0 : i32, i32
  }
  func.func @transform_2(%arg0: i32) -> (i32, i32) {
    %c0_i32 = arith.constant 0 : i32
    %c0_i32_0 = arith.constant 0 : i32
    %c0_i32_1 = arith.constant 0 : i32
    return %c0_i32, %c0_i32_0 : i32, i32
  }
  func.func @transform_3(%arg0: i32) -> (i32, i32) {
    %c0_i32 = arith.constant 0 : i32
    %c0_i32_0 = arith.constant 0 : i32
    %c0_i32_1 = arith.constant 0 : i32
    return %c0_i32, %c0_i32_0 : i32, i32
  }
  func.func @transform_4(%arg0: i32) -> (i32, i32) {
    %c0_i32 = arith.constant 0 : i32
    %c0_i32_0 = arith.constant 0 : i32
    %c0_i32_1 = arith.constant 0 : i32
    return %c0_i32, %c0_i32_0 : i32, i32
  }
  func.func @transform_5(%arg0: i32) -> (i32, i32) {
    %c0_i32 = arith.constant 0 : i32
    %c0_i32_0 = arith.constant 0 : i32
    return %arg0, %c0_i32 : i32, i32
  }
  func.func @transform_6(%arg0: i32) -> (i32, i32) {
    %c0_i32 = arith.constant 0 : i32
    %c0_i32_0 = arith.constant 0 : i32
    return %arg0, %c0_i32 : i32, i32
  }
}

</mosaic_0001>

<bundles_post_ra>
// kernel: tpu_custom_call.1
= control target key start
LH: loop header
LB: loop body
LE: loop exit
PB: predicated region body
PF: predicated region fallthrough
CT: control target
= control target key end

     0   :  { %12 = vsyncpa [#allocation3], 0  ;;  %s608_s0 = inlined_call_operand.hbm [shape: f32[4,32], index: 0, kind: input, shape index: {}]   ;;  %s609_s1 = inlined_call_operand.hbm [shape: bf16[32,256], index: 1, kind: input, shape index: {}]   ;;  %s610_s2 = inlined_call_operand.vmem [shape: f32[1,256], index: 2, kind: input, shape index: {}]   ;;  %s611_s3 = inlined_call_operand.hbm [shape: bf16[256,128], index: 3, kind: input, shape index: {}]   ;;  %s612_s4 = inlined_call_operand.vmem [shape: f32[1,128], index: 4, kind: input, shape index: {}]   ;;  %s613_s5 = inlined_call_operand.hbm [shape: bf16[4,128], index: 5, kind: output, shape index: {0}]   ;;  %s614_s6 = inlined_call_operand.vmem [shape: f32[4,1], index: 6, kind: output, shape index: {1}]  }
   0x1   :  { %13 = vsyncpa [#allocation6], 0 }
   0x2   :  { %14 = vsyncpa [#allocation4], 0  ;;  %s539_s21 = smov [#allocation5]  }
   0x3   :  { %s30_s22 = sshll.u32 %s539_s21, 4  ;;  %s31_s22 = int_to_ptr.vmem [resolvable:$true] %s30_s22 }
   0x4   :  { %s461_s23 = scalar_lea.vmem %s31_s22, 512  ;;  %p466_p1 = scmp.lt.s32.totalorder %s31_s22, %s31_s22 }
   0x5   :  { %p462_p0 = scmp.ne.s32.totalorder %s31_s22, %s461_s23  ;;  %p467_p2 = scmp.lt.s32.totalorder %s461_s23, %s461_s23 }
   0x7   :  { %p468_p3 = por %p467_p2, %p466_p1 }
   0x9   :  { %p469_p4 = pnand %p468_p3, %p462_p0 }
   0xb   :  { %472 = shalt.err (!%p469_p4)
}
   0xc   :  { %s540_s24 = smov 128   ;;  %s541_s25 = smov 8  }
   0xd   :  { %36 = dma.hbm_to_vmem [thread:$0]  %s609_s1, 512, %s31_s22, [#allocation6], %s540_s24, %s540_s24, %s541_s25  }
   0xe   :  { %s542_s28 = smov [#allocation2]   ;;  %s543_s30 = smov [#allocation7]  }
   0xf   :  { %s21_s29 = sshll.u32 %s542_s28, 4  ;;  %s44_s7 = sshll.u32 %s543_s30, 4  ;;  %s22_s29 = int_to_ptr.vmem [resolvable:$true] %s21_s29  ;;  %s45_s7 = int_to_ptr.vmem [resolvable:$true] %s44_s7 }
  0x10   :  { %s481_s8 = scalar_lea.vmem %s22_s29, 64  ;;  %p486_p6 = scmp.lt.s32.totalorder %s22_s29, %s22_s29 }
  0x11   :  { %p482_p5 = scmp.ne.s32.totalorder %s22_s29, %s481_s8  ;;  %p487_p7 = scmp.lt.s32.totalorder %s481_s8, %s481_s8 }
  0x13   :  { %p488_p8 = por %p487_p7, %p486_p6 }
  0x15   :  { %p489_p9 = pnand %p488_p8, %p482_p5 }
  0x17   :  { %492 = shalt.err (!%p489_p9)
}
  0x18   :  { %24 = dma.hbm_to_vmem [thread:$0]  %s608_s0, 64, %s22_s29, [#allocation3]  }
  0x19   :  { %s501_s11 = scalar_lea.vmem %s45_s7, 2048  ;;  %p506_p11 = scmp.lt.s32.totalorder %s45_s7, %s45_s7 }
  0x1a   :  { %p502_p10 = scmp.ne.s32.totalorder %s45_s7, %s501_s11  ;;  %p507_p12 = scmp.lt.s32.totalorder %s501_s11, %s501_s11 }
  0x1c   :  { %p508_p13 = por %p507_p12, %p506_p11 }
  0x1e   :  { %p509_p0 = pnand %p508_p13, %p502_p10 }
  0x20   :  { %512 = shalt.err (!%p509_p0)
}
  0x21   :  { %s544_s1 = smov 64   ;;  %s545_s12 = smov 4  }
  0x22   :  { %50 = dma.hbm_to_vmem [thread:$0]  %s611_s3, 2048, %s45_s7, [#allocation6], %s544_s1, %s544_s1, %s545_s12  }
  0x23   :  { %533 = dma.done.wait [#allocation3], 64  }
  0x24   :  { %534 = vsyncadd [#allocation3], 4294967232 }
  0x25   :  { %535 = dma.done.wait [#allocation6], 2560  }
  0x26   :  { %536 = vsyncadd [#allocation6], 4294964736  ;;  %v546_v0 = vmov 0   ;;  %v427_v1 = vld [vmem:[#allocation5 + $0x14] ss:$8 sps:$4 sm:$0xff]   ;;  %vm101_vm0 = vcmask 261120   ;;  %v71_v23 = vlaneseq }
  0x27   :  { %137 = vmatprep.mubr.bf16.mxu0 %v546_v0  ;;  %v429_v2 = vld [vmem:[#allocation5 + $0x10] ss:$8 sps:$4 sm:$0xff]   ;;  %117 = vmatprep.subr.bf16.mxu0 %v427_v1  ;;  %v430_v3 = vld [vmem:[#allocation5 + $0x4] ss:$8 sps:$4 sm:$0xff]   ;;  %v432_v4 = vld [vmem:[#allocation5] ss:$8 sps:$4 sm:$0xff]  }
  0x28   :  { %v63_v5 = vld [vmem:[#allocation2] sm:$0xf]  ;;  %118 = vmatpush1.bf16.msra.mxu0 %v429_v2  ;;  %v435_v8 = vld [vmem:[#allocation7 + $0x70] sm:$0xff]   ;;  %v437_v11 = vld [vmem:[#allocation7 + $0x68] sm:$0xff]   ;;  %v72_v24 = vshrl.u32 %v71_v23, 7  ;;  %v326_v40 = vand.u32 127, %v71_v23 }
  0x29   :  { %v433_v6 = vld [vmem:[#allocation7 + $0x78] sm:$0xff]   ;;  %119 = vmatprep.subr.bf16.mxu0 %v430_v3  ;;  %v64_v9 = vpack.c.bf16 %v63_v5, %v63_v5  ;;  %v436_v10 = vld [vmem:[#allocation7 + $0x30] sm:$0xff]   ;;  %v438_v12 = vld [vmem:[#allocation7 + $0x28] sm:$0xff]   ;;  %v547_v46 = vmov -inf   ;;  %vm331_vm3 = vcmask 1043456   ;;  %vm335_vm4 = vcmask 3072  }
  0x2a   :  { %v434_v7 = vld [vmem:[#allocation7 + $0x38] sm:$0xff]   ;;  %395 = vmatprep.subr.bf16.mxu1 %v433_v6  ;;  %v439_v13 = vld [vmem:[#allocation7 + $0x60] sm:$0xff]   ;;  %v443_v17 = vld [vmem:[#allocation7 + $0x50] sm:$0xff]   ;;  %v73_v25 = vsub.s32 0, %v72_v24  ;;  %v77_v27 = vsub.s32 1, %v72_v24  ;;  %vm337_vm1 = vcmp.lt.s32.totalorder %v326_v40, 8 }
  0x2b   :  { %396 = vmatpush3.bf16.msra.mxu1 %v434_v7  ;;  %v440_v14 = vld [vmem:[#allocation7 + $0x20] sm:$0xff]   ;;  %v441_v15 = vld [vmem:[#allocation7 + $0x58] sm:$0xff]   ;;  %v444_v18 = vld [vmem:[#allocation7 + $0x10] sm:$0xff]   ;;  %vm327_vm2 = vcmp.eq.s32.totalorder %v326_v40, 8  ;;  %v338_v47 = vsel %vm337_vm1, 0.0, %v547_v46  ;;  %s548_s17 = smov [#allocation8]  }
  0x2c   :  { %120 = vmatpush1.bf16.msra.mxu0 %v432_v4  ;;  %397 = vmatprep.subr.bf16.mxu1 %v435_v8  ;;  %v442_v16 = vld [vmem:[#allocation7 + $0x18] sm:$0xff]   ;;  %v445_v19 = vld [vmem:[#allocation7 + $0x48] sm:$0xff]   ;;  %v447_v21 = vld [vmem:[#allocation7 + $0x40] sm:$0xff]   ;;  %s359_s18 = sshll.u32 %s548_s17, 4  ;;  %s360_s18 = int_to_ptr.vmem [resolvable:$true] %s359_s18 }
  0x2d   :  { %v446_v20 = vld [vmem:[#allocation7 + $0x8] sm:$0xff]   ;;  %v448_v22 = vld [vmem:[#allocation7] sm:$0xff]   ;;  %v69_v26 = vld [vmem:[%s610_s2] sm:$0x3]  ;;  %s513_s19 = scalar_lea.vmem %s360_s18, 32  ;;  %p518_p2 = scmp.lt.s32.totalorder %s360_s18, %s360_s18 }
  0x2e   :  { %v74_v28 = vrot.slane %v69_v26, %v73_v25  ;;  %v78_v29 = vrot.slane %v69_v26, %v77_v27  ;;  %v378_v42 = vld [vmem:[%s612_s4] ss:$0 sm:$0xff]  ;;  %p514_p1 = scmp.ne.s32.totalorder %s360_s18, %s513_s19  ;;  %p519_p3 = scmp.lt.s32.totalorder %s513_s19, %s513_s19 }
  0x2f   :  { %377 = vmatmul.mubr.msk.bf16.vlgmr.msra.gmra.mxu0 %vm101_vm0, %v64_v9  ;;  %398 = vmatpush3.bf16.msra.mxu1 %v436_v10 }
  0x30   :  { %399 = vmatprep.subr.bf16.mxu1 %v437_v11  ;;  %p520_p4 = por %p519_p3, %p518_p2 }
  0x32   :  { %p521_p5 = pnand %p520_p4, %p514_p1 }
  0x33   :  { %400 = vmatpush3.bf16.msra.mxu1 %v438_v12 }
  0x34   :  { %401 = vmatprep.subr.bf16.mxu1 %v439_v13 }
  0x37   :  { %402 = vmatpush3.bf16.msra.mxu1 %v440_v14 }
  0x38   :  { %403 = vmatprep.subr.bf16.mxu1 %v441_v15 }
  0x3b   :  { %404 = vmatpush3.bf16.msra.mxu1 %v442_v16 }
  0x3c   :  { %405 = vmatprep.subr.bf16.mxu1 %v443_v17 }
  0x3f   :  { %406 = vmatpush3.bf16.msra.mxu1 %v444_v18 }
  0x40   :  { %407 = vmatprep.subr.bf16.mxu1 %v445_v19 }
  0x43   :  { %408 = vmatpush3.bf16.msra.mxu1 %v446_v20 }
  0x44   :  { %409 = vmatprep.subr.bf16.mxu1 %v447_v21 }
  0x47   :  { %410 = vmatpush3.bf16.msra.mxu1 %v448_v22 }
  0xef   :  { %v139_v30 = vpop.f32.mrf.mxu0 }
  0xf0   :  { %v140_v31 = vadd.f32 %v139_v30, %v74_v28 }
  0xf1   :  { %v141_v32 = vpop.f32.mrf.mxu0 }
  0xf2   :  { %v142_v33 = vadd.f32 %v141_v32, %v78_v29  ;;  %v146_v34 = vmax.f32 %v140_v31, 0.0 }
  0xf3   :  { %v143_v35 = vpop.f32.mrf.mxu0 }
  0xf4   :  { %v147_v36 = vmax.f32 %v142_v33, 0.0  ;;  %v148_v39 = vpack.c.bf16 %v146_v34, %v146_v34 }
  0xf5   :  { %v144_v37 = vpop.f32.mrf.mxu0 }
  0xf6   :  { %v149_v38 = vpack.c.bf16 %v147_v36, %v147_v36 }
  0xf8   :  { %317 = vmatprep.mubr.bf16.mxu1 %v149_v38 }
  0xf9   :  { %318 = vmatmul.mubr.bf16.vlgmr.msra.gmra.mxu1 %v148_v39 }
 0x1b9   :  { %v411_v41 = vpop.f32.mrf.mxu1 }
 0x1bb   :  { %v412_v43 = vpop.f32.mrf.mxu1 }
 0x1bc   :  { %v413_v44 = vadd.f32 %v412_v43, %v411_v41 }
 0x1bd   :  { %v414_v45 = vpop.f32.mrf.mxu1 }
 0x1be   :  { %v320_v48 = vadd.f32 %v413_v44, %v378_v42 }
 0x1bf   :  { %v415_v49 = vpop.f32.mrf.mxu1 }
 0x1c0   :  { %v330_v50 = vsel %vm327_vm2, %v320_v48, 0.0  ;;  %v339_v51 = vadd.f32 %v338_v47, %v320_v48 }
 0x1c1   :  { %v332_v52 = vsel %vm331_vm3, %v330_v50, 0.0 }
 0x1c2   :  { %333 = vadd.xlane.f32.xlu1 %v332_v52  ;;  %v340_v53 = vsel %vm331_vm3, %v339_v51, -inf }
 0x1c3   :  { %341 = vmax.xlane.f32.xlu0 %v340_v53 }
 0x24b   :  { %v334_v54 = vpop.xlane.xlu1 %333 }
 0x24c   :  { %336 = vst.msk [vmem:[%s614_s6] sm:$0xf] %vm335_vm4, %v334_v54  ;;  %v342_v55 = vpop.xlane.xlu0 %341 }
 0x24d   :  { %v343_v56 = vsub.f32 %v339_v51, %v342_v55 }
 0x24f   :  { %v344_v57 = vmul.f32 1.442695, %v343_v56 }
 0x251   :  { %449 = vpow2.f32 %v344_v57 }
 0x25e   :  { %v450_v58 = vpop.eup %449 }
 0x25f   :  { %v346_v59 = vsel %vm331_vm3, %v450_v58, 0.0 }
 0x260   :  { %347 = vadd.xlane.f32.xlu0 %v346_v59 }
 0x2e9   :  { %v348_v60 = vpop.xlane.xlu0 %347 }
 0x2ea   :  { %451 = vrcp.f32 %v348_v60 }
 0x2f7   :  { %v452_v61 = vpop.eup %451 }
 0x2f8   :  { %v350_v62 = vmul.f32 %v452_v61, %v450_v58 }
 0x2fa   :  { %v351_v63 = vpack.c.bf16 %v350_v62, %v350_v62 }
 0x2fc   :  { %352 = vst [vmem:[#allocation8] sm:$0x3] %v351_v63 }
 0x2fd   :  { %524 = shalt.err (!%p521_p5)
}
 0x2fe   :  { %362 = dma.vmem_to_hbm [thread:$0]  %s360_s18, 32, %s613_s5, [#allocation4]  }
 0x2ff   :  { %537 = dma.done.wait [#allocation4], 32  }
 0x300   :  { %538 = vsyncadd [#allocation4], 4294967264 }
 0x301   :  { %370 = vsyncpa [#allocation3], 1 }
 0x302   :  { %371 = vsyncpa [#allocation6], 1 }
 0x303   :  { %372 = vsyncpa [#allocation4], 1 }

</bundles_post_ra>
